<compile_context>
chip_gen: v5e
topology: v5e:2x2
jax: 0.10.0
libtpu: 0.0.40
codegen_flags: <defaults>
</compile_context>

<pallas_src>
import functools

import jax
import jax.numpy as jnp
from jax.experimental import pallas as pl
from jax.experimental.pallas import tpu as pltpu

DEFAULT_COMPUTE_DTYPE = jnp.bfloat16  # MXU-native on v5e / v6e / v7x


def _round_up(x: int, m: int) -> int:
    return (x + m - 1) // m * m


def _pick_tile(dim_p: int, unit: int, target: int) -> int:
    """Largest multiple of `unit` that divides dim_p and is <= max(unit, target)."""
    target = max(unit, min(target, dim_p))
    q = dim_p // unit
    best = 1
    d = 1
    while d * d <= q:
        if q % d == 0:
            for c in (d, q // d):
                if c * unit <= target:
                    best = max(best, c)
        d += 1
    return best * unit


def _vmem_capacity_bytes() -> int:
    try:
        return int(pltpu.get_tpu_info().vmem_capacity_bytes)
    except Exception:
        return 64 << 20  # conservative default (v7x per-TensorCore)


def _linear_kernel(*refs, has_bias, fuse_relu, acc_in_out):
    """One (tm, tn) output tile, accumulating over the K grid axis."""
    if has_bias:
        x_ref, w_ref, b_ref = refs[:3]
        rest = refs[3:]
    else:
        x_ref, w_ref = refs[:2]
        b_ref = None
        rest = refs[2:]

    if acc_in_out:
        (o_ref,) = rest
        acc_ref = o_ref            # f32 output doubles as the accumulator
    else:
        o_ref, acc_ref = rest

    k = pl.program_id(2)

    @pl.when(k == 0)
    def _():
        acc_ref[...] = jnp.zeros_like(acc_ref)

    acc_ref[...] += jnp.dot(
        x_ref[...], w_ref[...], preferred_element_type=jnp.float32
    )

    if has_bias or fuse_relu or not acc_in_out:
        @pl.when(k == pl.num_programs(2) - 1)
        def _():
            out = acc_ref[...]
            if has_bias:
                out = out + b_ref[...].astype(jnp.float32)  # (1, tn) broadcasts
            if fuse_relu:
                out = jnp.maximum(out, 0.0)
            o_ref[...] = out.astype(o_ref.dtype)


def linear_pallas(x, weight, bias=None, fuse_activation=False, *,
                  out_features=None, compute_dtype=DEFAULT_COMPUTE_DTYPE,
                  tm=None, tn=None, tk=None):
    """Pallas equivalent of tritonformer Linear.forward.

    `weight` may be the raw (in_features, out_features) parameter, or a
    pre-padded / pre-cast copy (pass `out_features` for the true width).
    """
    Kx = x.shape[-1]
    Kw, Nw = weight.shape
    assert Kw >= Kx, "weight rows must cover x features"
    n_valid = int(out_features) if out_features is not None else Nw
    assert n_valid <= Nw

    lead = x.shape[:-1]
    out_dtype = x.dtype

    cd = jnp.dtype(compute_dtype) if compute_dtype is not None else jnp.dtype(x.dtype)
    unit_m = max(8, 32 // cd.itemsize)  # packed-sublane multiple (8/16/32)

    x2 = x.reshape(-1, Kx)
    M = x2.shape[0]

    # Generation-aware tile targets: v5e/v6e (128 MiB VMEM) take 1024-tiles,
    # v7x (64 MiB per TensorCore) stays at 512.
    vmem_cap = _vmem_capacity_bytes()
    big_vmem = vmem_cap >= (96 << 20)
    tgt_mn = 1024 if big_vmem else 512
    tgt_k = 1024

    tn_user = tn
    # ---- N: pad to 128 (not to the tile), then pick a tile dividing N_p ----
    if tn is None:
        N_p = _round_up(Nw, 128)
        tn = _pick_tile(N_p, 128, tgt_mn)
    else:
        tn = _round_up(tn, 128)
        N_p = _round_up(Nw, tn)
    # ---- K ----
    if tk is None:
        K_p = _round_up(Kw, 128)
        tk = _pick_tile(K_p, 128, tgt_k)
    else:
        tk = _round_up(tk, 128)
        K_p = _round_up(Kw, tk)
    # ---- M ----
    if tm is None:
        M_p = _round_up(M, unit_m)
        tm = _pick_tile(M_p, unit_m, tgt_mn)
    else:
        tm = _round_up(tm, unit_m)
        M_p = _round_up(M, tm)

    # Guarantee >=2 parallel grid steps so v7x's two TensorCores both get work.
    if tn_user is None and (M_p // tm) * (N_p // tn) == 1 and tn % 256 == 0:
        tn //= 2

    # Operand cast + padding.  These are no-ops when the module pre-packed the
    # weight/bias (the common path); x is small relative to the weight.
    if x2.dtype != cd:
        x2 = x2.astype(cd)
    w2 = weight
    if w2.dtype != cd:
        w2 = w2.astype(cd)
    if (M_p, K_p) != (M, Kx):
        x2 = jnp.pad(x2, ((0, M_p - M), (0, K_p - Kx)))
    if (K_p, N_p) != (Kw, Nw):
        w2 = jnp.pad(w2, ((0, K_p - Kw), (0, N_p - Nw)))

    has_bias = bias is not None
    operands = [x2, w2]
    in_specs = [
        pl.BlockSpec((tm, tk), lambda i, j, k: (i, k)),   # x tile
        pl.BlockSpec((tk, tn), lambda i, j, k: (k, j)),   # weight tile
        # TODO(synk): on v5e decode shapes (M<=128) a deeper weight pipeline
        # (pipeline_mode=pl.Buffered(3)) can hide exposed DMA; sweep on HW.
    ]
    if has_bias:
        b2 = bias.reshape(1, -1)
        if b2.dtype != jnp.float32:
            b2 = b2.astype(jnp.float32)
        if b2.shape[1] != N_p:
            b2 = jnp.pad(b2, ((0, 0), (0, N_p - b2.shape[1])))
        operands.append(b2)
        in_specs.append(pl.BlockSpec((1, tn), lambda i, j, k: (0, j)))

    grid = (M_p // tm, N_p // tn, K_p // tk)
    acc_in_out = jnp.dtype(out_dtype) == jnp.dtype(jnp.float32)

    # Explicit scoped-VMEM budget: double-buffered input/output tiles
    # (+ f32 scratch when the output dtype is not f32), with headroom, capped
    # at the chip's actual VMEM capacity instead of a universal 64 MiB.
    it_o = jnp.dtype(out_dtype).itemsize
    vmem_needed = (2 * tm * tk * x2.dtype.itemsize
                   + 2 * tk * tn * w2.dtype.itemsize
                   + 2 * tm * tn * it_o)
    if not acc_in_out:
        vmem_needed += tm * tn * 4
    if has_bias:
        vmem_needed += 2 * tn * 4
    vmem_limit = int(min(vmem_needed + (32 << 20), vmem_cap))

    cost = pl.CostEstimate(
        flops=2 * M_p * N_p * K_p,
        transcendentals=0,
        # Account for re-streaming: x read once per N tile, W once per M tile.
        bytes_accessed=(grid[1] * M_p * K_p * x2.dtype.itemsize
                        + grid[0] * K_p * N_p * w2.dtype.itemsize
                        + M_p * N_p * it_o),
    )

    scratch_shapes = [] if acc_in_out else [pltpu.VMEM((tm, tn), jnp.float32)]

    out = pl.pallas_call(
        functools.partial(_linear_kernel, has_bias=has_bias,
                          fuse_relu=fuse_activation, acc_in_out=acc_in_out),
        out_shape=jax.ShapeDtypeStruct((M_p, N_p), out_dtype),
        grid_spec=pltpu.PrefetchScalarGridSpec(
            num_scalar_prefetch=0,
            grid=grid,
            in_specs=in_specs,
            out_specs=pl.BlockSpec((tm, tn), lambda i, j, k: (i, j)),
            scratch_shapes=scratch_shapes,
        ),
        compiler_params=pltpu.CompilerParams(
            dimension_semantics=("parallel", "parallel", "arbitrary"),
            vmem_limit_bytes=vmem_limit,
        ),
        cost_estimate=cost,
    )(*operands)

    if (M_p, N_p) != (M, n_valid):
        out = out[:M, :n_valid]
    return out.reshape(*lead, n_valid)


class LinearPallas:
    """Mirror of tritonformer.nn.Linear (forward only)."""

    def __init__(self, in_features, out_features, bias=True,
                 fuse_activation=False, *, key, dtype=jnp.float32,
                 compute_dtype=DEFAULT_COMPUTE_DTYPE):
        self.in_features = in_features
        self.out_features = out_features
        self.fuse_activation = fuse_activation
        self.compute_dtype = (jnp.dtype(compute_dtype)
                              if compute_dtype is not None else jnp.dtype(dtype))

        kw, kb = jax.random.split(key)
        # Deterministic synthetic init (the module's reset_parameters is a no-op).
        self.weight = jax.random.normal(kw, (in_features, out_features), dtype) * 0.02
        self.bias = (jax.random.normal(kb, (out_features,), dtype) * 0.02
                     if bias else None)

        # Pre-cast / pre-pad the weight & bias ONCE so per-call dispatch never
        # pays a full HBM pad/cast pass over the weight.
        K_p = _round_up(in_features, 128)
        N_p = _round_up(out_features, 128)
        w = self.weight.astype(self.compute_dtype)
        if (K_p, N_p) != (in_features, out_features):
            w = jnp.pad(w, ((0, K_p - in_features), (0, N_p - out_features)))
        self._weight_packed = w
        if bias:
            b = self.bias.astype(jnp.float32).reshape(1, -1)
            if N_p != out_features:
                b = jnp.pad(b, ((0, 0), (0, N_p - out_features)))
            self._bias_packed = b
        else:
            self._bias_packed = None
        # TODO(synk): int8 (v5e/v6e) / fp8 (v7x) weight path with per-tile
        # scales would halve weight DMA again for serving workloads.

    def __call__(self, x):
        return linear_pallas(
            x, self._weight_packed, self._bias_packed, self.fuse_activation,
            out_features=self.out_features, compute_dtype=self.compute_dtype)


if __name__ == "__main__":
    key = jax.random.PRNGKey(0)
    k_x, k_mod, k_big = jax.random.split(key, 3)

    batch, seq, in_features, out_features = 2, 8, 32, 32
    x = jax.random.normal(k_x, (batch, seq, in_features), jnp.float32)

    # 1) Fused bias + ReLU, bf16 MXU operands (default), pre-packed weight.
    mod = LinearPallas(in_features, out_features, bias=True,
                       fuse_activation=True, key=k_mod)
    y = mod(x)
    jax.block_until_ready(y)
    ref = jnp.maximum(jnp.einsum("bsk,kn->bsn", x, mod.weight) + mod.bias, 0.0)
    assert y.shape == (batch, seq, out_features)
    assert jnp.allclose(y, ref, atol=1e-2, rtol=1e-2), "bias+relu path mismatch"

    # 2) No-bias / no-activation path (bias stream dropped entirely).
    mod2 = LinearPallas(in_features, out_features, bias=False,
                        fuse_activation=False, key=k_mod)
    y2 = mod2(x)
    jax.block_until_ready(y2)
    ref2 = jnp.einsum("bsk,kn->bsn", x, mod2.weight)
    assert jnp.allclose(y2, ref2, atol=1e-2, rtol=1e-2), "no-bias path mismatch"

    # 3) Multi-tile (i, j, k) grid with explicit 128-tiles and exact f32 compute
    #    (exercises K-axis accumulation + user tile rounding + raw weight path).
    M3, K3, N3 = 256, 256, 384
    kx3, kw3, kb3 = jax.random.split(k_big, 3)
    x3 = jax.random.normal(kx3, (M3, K3), jnp.float32)
    w3 = jax.random.normal(kw3, (K3, N3), jnp.float32) * 0.02
    b3 = jax.random.normal(kb3, (N3,), jnp.float32) * 0.02
    y3 = linear_pallas(x3, w3, b3, fuse_activation=True,
                       compute_dtype=jnp.float32, tm=128, tn=128, tk=128)
    jax.block_until_ready(y3)
    ref3 = jnp.maximum(x3 @ w3 + b3, 0.0)
    assert jnp.allclose(y3, ref3, atol=1e-3, rtol=1e-3), "multi-tile f32 mismatch"

    # 4) bf16 activations -> bf16 output (exercises the f32-scratch epilogue).
    x4 = x3.astype(jnp.bfloat16)
    y4 = linear_pallas(x4, w3, b3, fuse_activation=False)
    jax.block_until_ready(y4)
    ref4 = (x4.astype(jnp.float32) @ w3 + b3).astype(jnp.bfloat16)
    assert y4.dtype == jnp.bfloat16
    assert jnp.allclose(y4.astype(jnp.float32), ref4.astype(jnp.float32),
                        atol=5e-2, rtol=5e-2), "bf16-output path mismatch"

    print("KERNEL_OK")
</pallas_src>

<mosaic_0001>
module attributes {stable_mosaic.version = 11 : i64} {
  func.func @_linear_kernel(%arg0: i32, %arg1: i32, %arg2: i32, %arg3: memref<16x128xbf16, #tpu.memory_space<vmem>>, %arg4: memref<128x128xbf16, #tpu.memory_space<vmem>>, %arg5: memref<1x128xf32, #tpu.memory_space<vmem>>, %arg6: memref<16x128xf32, #tpu.memory_space<vmem>>) attributes {dimension_semantics = [#tpu.dimension_semantics<parallel>, #tpu.dimension_semantics<parallel>, #tpu.dimension_semantics<arbitrary>], iteration_bounds = array<i64: 1, 1, 1>, scalar_prefetch = 0 : i64, scratch_operands = 0 : i64, tpu.core_type = #tpu.core_type<tc>, window_params = [{transform_indices = @transform_0, window_bounds = array<i64: 16, 128>}, {transform_indices = @transform_1, window_bounds = array<i64: 128, 128>}, {transform_indices = @transform_2, window_bounds = array<i64: 1, 128>}, {transform_indices = @transform_3, window_bounds = array<i64: 16, 128>}]} {
    %c0_i32 = arith.constant 0 : i32
    %0 = arith.cmpi eq, %arg2, %c0_i32 : i32
    %1 = arith.extui %0 : i1 to i32
    %c0_i32_0 = arith.constant 0 : i32
    %2 = arith.cmpi ne, %1, %c0_i32_0 : i32
    scf.if %2 {
      %cst_10 = arith.constant 0.000000e+00 : f32
      %12 = vector.broadcast %cst_10 : f32 to vector<16x128xf32>
      %c0_11 = arith.constant 0 : index
      %c0_12 = arith.constant 0 : index
      %13 = vector.load %arg6[%c0_11, %c0_12] : memref<16x128xf32, #tpu.memory_space<vmem>>, vector<16x128xf32>
      tpu.vector_store %arg6[%c0_11, %c0_12], %12 {strides = array<i32>} : memref<16x128xf32, #tpu.memory_space<vmem>>, vector<16x128xf32>,
    } else {
    }
    %c0 = arith.constant 0 : index
    %c0_1 = arith.constant 0 : index
    %3 = vector.load %arg6[%c0, %c0_1] : memref<16x128xf32, #tpu.memory_space<vmem>>, vector<16x128xf32>
    %c0_2 = arith.constant 0 : index
    %c0_3 = arith.constant 0 : index
    %4 = vector.load %arg3[%c0_2, %c0_3] : memref<16x128xbf16, #tpu.memory_space<vmem>>, vector<16x128xbf16>
    %c0_4 = arith.constant 0 : index
    %c0_5 = arith.constant 0 : index
    %5 = vector.load %arg4[%c0_4, %c0_5] : memref<128x128xbf16, #tpu.memory_space<vmem>>, vector<128x128xbf16>
    %cst = arith.constant dense<0.000000e+00> : vector<16x128xf32>
    %6 = tpu.matmul %4, %5, %cst {dimension_numbers = #tpu.dot_dimension_numbers<[1], [0], [0], [1], [0, 0, 1, 1], [], []>} : vector<16x128xbf16>, vector<128x128xbf16>, vector<16x128xf32> -> vector<16x128xf32>
    %7 = arith.addf %3, %6 : vector<16x128xf32>
    %c0_6 = arith.constant 0 : index
    %c0_7 = arith.constant 0 : index
    %8 = vector.load %arg6[%c0_6, %c0_7] : memref<16x128xf32, #tpu.memory_space<vmem>>, vector<16x128xf32>
    tpu.vector_store %arg6[%c0_6, %c0_7], %7 {strides = array<i32>} : memref<16x128xf32, #tpu.memory_space<vmem>>, vector<16x128xf32>,
    %c0_i32_8 = arith.constant 0 : i32
    %9 = arith.cmpi eq, %arg2, %c0_i32_8 : i32
    %10 = arith.extui %9 : i1 to i32
    %c0_i32_9 = arith.constant 0 : i32
    %11 = arith.cmpi ne, %10, %c0_i32_9 : i32
    scf.if %11 {
      %c0_10 = arith.constant 0 : index
      %c0_11 = arith.constant 0 : index
      %12 = vector.load %arg6[%c0_10, %c0_11] : memref<16x128xf32, #tpu.memory_space<vmem>>, vector<16x128xf32>
      %c0_12 = arith.constant 0 : index
      %c0_13 = arith.constant 0 : index
      %13 = vector.load %arg5[%c0_12, %c0_13] : memref<1x128xf32, #tpu.memory_space<vmem>>, vector<1x128xf32>
      %14 = vector.broadcast %13 : vector<1x128xf32> to vector<16x128xf32>
      %15 = arith.addf %12, %14 : vector<16x128xf32>
      %cst_14 = arith.constant 0.000000e+00 : f32
      %16 = vector.broadcast %cst_14 : f32 to vector<16x128xf32>
      %17 = arith.maximumf %15, %16 : vector<16x128xf32>
      %c0_15 = arith.constant 0 : index
      %c0_16 = arith.constant 0 : index
      %18 = vector.load %arg6[%c0_15, %c0_16] : memref<16x128xf32, #tpu.memory_space<vmem>>, vector<16x128xf32>
      tpu.vector_store %arg6[%c0_15, %c0_16], %17 {strides = array<i32>} : memref<16x128xf32, #tpu.memory_space<vmem>>, vector<16x128xf32>,
    } else {
    }
    return
  }
  func.func @transform_0(%arg0: i32, %arg1: i32, %arg2: i32) -> (i32, i32) {
    %c0_i32 = arith.constant 0 : i32
    return %arg0, %arg2 : i32, i32
  }
  func.func @transform_1(%arg0: i32, %arg1: i32, %arg2: i32) -> (i32, i32) {
    %c0_i32 = arith.constant 0 : i32
    return %arg2, %arg1 : i32, i32
  }
  func.func @transform_2(%arg0: i32, %arg1: i32, %arg2: i32) -> (i32, i32) {
    %c0_i32 = arith.constant 0 : i32
    %c0_i32_0 = arith.constant 0 : i32
    return %c0_i32, %arg1 : i32, i32
  }
  func.func @transform_3(%arg0: i32, %arg1: i32, %arg2: i32) -> (i32, i32) {
    %c0_i32 = arith.constant 0 : i32
    return %arg0, %arg1 : i32, i32
  }
}

</mosaic_0001>

<bundles_post_ra>
// kernel: tpu_custom_call.1
= control target key start
LH: loop header
LB: loop body
LE: loop exit
PB: predicated region body
PF: predicated region fallthrough
CT: control target
= control target key end

     0   :  { %8 = vsyncpa [#allocation3], 0  ;;  %s351_s0 = inlined_call_operand.hbm [shape: bf16[16,128], index: 0, kind: input, shape index: {}]   ;;  %s352_s1 = inlined_call_operand.hbm [shape: bf16[128,128], index: 1, kind: input, shape index: {}]   ;;  %s353_s2 = inlined_call_operand.vmem [shape: f32[1,128], index: 2, kind: input, shape index: {}]   ;;  %s354_s3 = inlined_call_operand.hbm [shape: f32[16,128], index: 3, kind: output, shape index: {}]  }
   0x1   :  { %9 = vsyncpa [#allocation6], 0 }
   0x2   :  { %10 = vsyncpa [#allocation4], 0  ;;  %s15_s14 = sshll.u32 %s351_s0, 4  ;;  %s312_s15 = smov [#allocation2]   ;;  %s16_s14 = int_to_ptr.hbm [resolvable:$true] %s15_s14 }
   0x3   :  { %s17_s16 = sshll.u32 %s312_s15, 4  ;;  %s28_s19 = sshll.u32 %s352_s1, 4  ;;  %s18_s16 = int_to_ptr.vmem [resolvable:$true] %s17_s16  ;;  %s29_s19 = int_to_ptr.hbm [resolvable:$true] %s28_s19 }
   0x4   :  { %s313_s20 = smov 64   ;;  %s314_s21 = smov 4  }
   0x5   :  { %23 = dma.hbm_to_vmem [thread:$0]  %s16_s14, 128, %s18_s16, [#allocation3], %s313_s20, %s313_s20, %s314_s21  }
   0x6   :  { %s315_s22 = smov [#allocation5]  }
   0x7   :  { %s30_s23 = sshll.u32 %s315_s22, 4  ;;  %s31_s23 = int_to_ptr.vmem [resolvable:$true] %s30_s23 }
   0x8   :  { %36 = dma.hbm_to_vmem [thread:$0]  %s29_s19, 1024, %s31_s23, [#allocation6], %s313_s20, %s313_s20, %s314_s21  }
   0x9   :  { %306 = dma.done.wait [#allocation3], 128  }
   0xa   :  { %307 = vsyncadd [#allocation3], 4294967168 }
   0xb   :  { %308 = dma.done.wait [#allocation6], 1024  }
   0xc   :  { %309 = vsyncadd [#allocation6], 4294966272  ;;  %v224_v0 = vld [vmem:[#allocation5 + $0x38] sm:$0xff]  ;;  %v223_v1 = vld [vmem:[#allocation5 + $0x30] sm:$0xff]  ;;  %s316_s24 = smov [#allocation7]   ;;  %s166_s28 = sshll.u32 %s354_s3, 4  ;;  %s167_s28 = int_to_ptr.hbm [resolvable:$true] %s166_s28 }
   0xd   :  { %127 = vmatpush.bf16.msra.mxu0 %v224_v0  ;;  %v222_v2 = vld [vmem:[#allocation5 + $0x28] sm:$0xff]  ;;  %v221_v3 = vld [vmem:[#allocation5 + $0x20] sm:$0xff]  ;;  %v220_v4 = vld [vmem:[#allocation5 + $0x18] sm:$0xff]  ;;  %s164_s25 = sshll.u32 %s316_s24, 4  ;;  %s317_s29 = smov 128   ;;  %s165_s25 = int_to_ptr.vmem [resolvable:$true] %s164_s25 }
   0xe   :  { %v219_v5 = vld [vmem:[#allocation5 + $0x10] sm:$0xff]  ;;  %v218_v6 = vld [vmem:[#allocation5 + $0x8] sm:$0xff]  ;;  %v217_v7 = vld [vmem:[#allocation5] sm:$0xff]  ;;  %s318_s30 = smov 8  }
   0xf   :  { %v216_v8 = vld [vmem:[#allocation2] sm:$0xff] }
  0x10   :  { %v233_v9 = vld [vmem:[%s353_s2] ss:$0 sm:$0xff] }
  0x11   :  { %128 = vmatpush.bf16.msra.mxu0 %v223_v1 }
  0x15   :  { %129 = vmatpush.bf16.msra.mxu0 %v222_v2 }
  0x19   :  { %130 = vmatpush.bf16.msra.mxu0 %v221_v3 }
  0x1d   :  { %131 = vmatpush.bf16.msra.mxu0 %v220_v4 }
  0x21   :  { %132 = vmatpush.bf16.msra.mxu0 %v219_v5 }
  0x25   :  { %133 = vmatpush.bf16.msra.mxu0 %v218_v6 }
  0x29   :  { %134 = vmatpush.bf16.msra.mxu0 %v217_v7 }
  0x2c   :  { %135 = vmatmul.bf16.vlgmr.msra.gmra.mxu0 %v216_v8 }
  0xa9   :  { %v136_v10 = vpop.f32.mrf.mxu0 }
  0xaa   :  { %v154_v11 = vadd.f32 %v233_v9, %v136_v10 }
  0xac   :  { %v156_v12 = vmax.f32 %v154_v11, 0.0 }
  0xae   :  { %158 = vst [vmem:[#allocation7] sm:$0xff] %v156_v12 }
  0xb1   :  { %v138_v13 = vpop.f32.mrf.mxu0 }
  0xb2   :  { %v155_v14 = vadd.f32 %v233_v9, %v138_v13 }
  0xb4   :  { %v157_v15 = vmax.f32 %v155_v14, 0.0 }
  0xb6   :  { %159 = vst [vmem:[#allocation7 + $0x8] sm:$0xff] %v157_v15 }
  0xb7   :  { %172 = dma.vmem_to_hbm [thread:$0]  %s165_s25, 256, %s167_s28, [#allocation4], %s317_s29, %s317_s29, %s318_s30  }
  0xb8   :  { %310 = dma.done.wait [#allocation4], 256  }
  0xb9   :  { %311 = vsyncadd [#allocation4], 4294967040 }
  0xba   :  { %177 = vsyncpa [#allocation3], 1 }
  0xbb   :  { %178 = vsyncpa [#allocation6], 1 }
  0xbc   :  { %179 = vsyncpa [#allocation4], 1 }

</bundles_post_ra>
